<compile_context>
chip_gen: v7x
topology: tpu7x:2x2x1
jax: 0.10.0
libtpu: 0.0.40
codegen_flags: <defaults>
</compile_context>

<pallas_src>
import functools

import jax
import jax.numpy as jnp
from jax.experimental import pallas as pl
from jax.experimental.pallas import tpu as pltpu

K = 30  # fixed low-rank factor of the reference module


def _round_up(x: int, m: int) -> int:
    return ((x + m - 1) // m) * m


def _concat_kernel(e1_ref, e2_ref, out_ref, *, d1: int):
    """[e1, sigmoid(e2), sigmoid(e2)*e1] via three lane-offset sub-block stores.

    No jnp.concatenate: that would materialize a lane-shifted temp through the
    XLU before one big masked store.  Three direct stores are plain VPU -> vst
    traffic (fully dense when d1 is a multiple of 128).
    """
    e1 = e1_ref[...]
    sig = jax.nn.sigmoid(e2_ref[...])
    out_ref[:, 0:d1] = e1.astype(out_ref.dtype)
    out_ref[:, d1:2 * d1] = sig.astype(out_ref.dtype)
    out_ref[:, 2 * d1:3 * d1] = (sig * e1).astype(out_ref.dtype)


def _fused_kernel(e1_ref, e2_ref, u_ref, v_ref, out_ref, fused_ref, acc_ref,
                  *, d1: int, k: int, inv_k: float):
    """Grid = (batch blocks, k).  One rank slice per step, accumulated in VMEM."""
    j = pl.program_id(1)

    # The returned concat is independent of the K axis: emit it once per batch tile.
    @pl.when(j == 0)
    def _():
        e1 = e1_ref[...]
        sig = jax.nn.sigmoid(e2_ref[...])
        out_ref[:, 0:d1] = e1.astype(out_ref.dtype)
        out_ref[:, d1:2 * d1] = sig.astype(out_ref.dtype)
        out_ref[:, 2 * d1:3 * d1] = (sig * e1).astype(out_ref.dtype)
        acc_ref[...] = jnp.zeros_like(acc_ref)

    # One rank per grid step: (tb, d1) @ (d1, o_pad) on the MXU, f32 accumulate.
    xu = jnp.dot(e1_ref[...].astype(u_ref.dtype), u_ref[...],
                 preferred_element_type=jnp.float32)
    xv = jnp.dot(e2_ref[...].astype(v_ref.dtype), v_ref[...],
                 preferred_element_type=jnp.float32)
    acc_ref[...] += xu * xv

    @pl.when(j == k - 1)
    def _():
        x = acc_ref[...] * inv_k                      # restore the mean's 1/k
        # torch F.normalize(p=2, dim=-1, eps=1e-12); padded lanes are exact zeros.
        norm = jnp.sqrt(jnp.sum(x * x, axis=-1, keepdims=True))
        fused_ref[...] = (x / jnp.maximum(norm, 1e-12)).astype(fused_ref.dtype)


def lowfer_forward(e1, e2, U, V, o, *, k=K, compute_fused=True,
                   block_b=512, matmul_dtype=jnp.bfloat16,
                   out_dtype=jnp.float32, lane_align=128):
    B, d1 = e1.shape
    d2 = e2.shape[1]
    ko = k * o
    assert U.shape == (d1, ko) and V.shape == (d2, ko)
    assert d1 == d2, "reference forward requires d1 == d2 (it computes e2 * e1)"

    # Batch tile: large to amortize per-grid-step overhead (the concat path is
    # HBM-bandwidth bound), but capped so the grid has >= 2 steps whenever B
    # allows (so "parallel" can shard the batch across both v7x TensorCores).
    tb = min(block_b, B)
    if B > 8:
        tb = min(tb, max(8, _round_up(pl.cdiv(B, 2), 8)))
    nb = pl.cdiv(B, tb)

    osize = jnp.dtype(out_dtype).itemsize
    # TODO(synk): bandwidth-bound callers can pass out_dtype=jnp.bfloat16 to cut
    # the dominant writeback (3*d1 of the 5*d1 bytes per row) in half.

    if not compute_fused:
        out = pl.pallas_call(
            functools.partial(_concat_kernel, d1=d1),
            out_shape=jax.ShapeDtypeStruct((B, 3 * d1), out_dtype),
            grid=(nb,),
            in_specs=[pl.BlockSpec((tb, d1), lambda b: (b, 0)),
                      pl.BlockSpec((tb, d2), lambda b: (b, 0))],
            out_specs=pl.BlockSpec((tb, 3 * d1), lambda b: (b, 0)),
            compiler_params=pltpu.CompilerParams(
                dimension_semantics=("parallel",)),
            cost_estimate=pl.CostEstimate(
                flops=int(8 * B * d1),
                transcendentals=int(B * d2),
                bytes_accessed=int((B * d1 + B * d2) * 4 + B * 3 * d1 * osize)),
        )(e1, e2)
        return out, None

    # ---- auxiliary LowFER pooling branch (dead in the reference return) ----
    o_pad = _round_up(o, lane_align)

    # Permute the k*o columns once at trace time so rank j owns a contiguous
    # (d, o) weight slice: W_p[j, :, i] == W[:, i*k + j].  o is zero-padded to a
    # lane multiple so matmuls / accumulator / pooled output are lane-dense;
    # zero columns contribute nothing to the product, the sum or the L2 norm.
    def _permute(W, d):
        Wp = W.reshape(d, o, k).transpose(2, 0, 1)          # (k, d, o)
        if o_pad != o:
            Wp = jnp.pad(Wp, ((0, 0), (0, 0), (0, o_pad - o)))
        return Wp.astype(matmul_dtype)

    # TODO(synk): on v7x this aux branch could run the weights in fp8
    # (matmul_dtype=jnp.float8_e4m3fn) for ~2x MXU throughput and half the DMA.
    U_p = _permute(U, d1)
    V_p = _permute(V, d2)

    wsize = jnp.dtype(matmul_dtype).itemsize
    cost = pl.CostEstimate(
        flops=int(8 * B * d1 + 4 * B * d1 * k * o_pad + 3 * B * k * o_pad),
        transcendentals=int(B * d2),
        bytes_accessed=int((B * d1 + B * d2) * 4
                           + (d1 + d2) * k * o_pad * wsize
                           + B * 3 * d1 * osize + B * o_pad * 4),
    )

    out, fused = pl.pallas_call(
        functools.partial(_fused_kernel, d1=d1, k=k, inv_k=1.0 / k),
        out_shape=(jax.ShapeDtypeStruct((B, 3 * d1), out_dtype),
                   jax.ShapeDtypeStruct((B, o_pad), jnp.float32)),
        grid=(nb, k),
        in_specs=[pl.BlockSpec((tb, d1), lambda b, j: (b, 0)),
                  pl.BlockSpec((tb, d2), lambda b, j: (b, 0)),
                  pl.BlockSpec((None, d1, o_pad), lambda b, j: (j, 0, 0)),
                  pl.BlockSpec((None, d2, o_pad), lambda b, j: (j, 0, 0))],
        out_specs=(pl.BlockSpec((tb, 3 * d1), lambda b, j: (b, 0)),
                   pl.BlockSpec((tb, o_pad), lambda b, j: (b, 0))),
        scratch_shapes=[pltpu.VMEM((tb, o_pad), jnp.float32)],
        compiler_params=pltpu.CompilerParams(
            dimension_semantics=("parallel", "arbitrary")),
        cost_estimate=cost,
    )(e1, e2, U_p, V_p)

    return out, fused[:, :o]


def reference(e1, e2, U, V, o, k=K, matmul_dtype=None):
    """Pure-JAX reference of the PyTorch forward (optionally precision-matched)."""
    if matmul_dtype is not None:
        xu = jnp.dot(e1.astype(matmul_dtype), U.astype(matmul_dtype),
                     preferred_element_type=jnp.float32)
        xv = jnp.dot(e2.astype(matmul_dtype), V.astype(matmul_dtype),
                     preferred_element_type=jnp.float32)
    else:
        xu = e1 @ U
        xv = e2 @ V
    x = (xu * xv).reshape(e1.shape[0], o, k).mean(-1)
    x = x / jnp.maximum(jnp.sqrt(jnp.sum(x * x, -1, keepdims=True)), 1e-12)
    sig = jax.nn.sigmoid(e2)
    out = jnp.concatenate([e1, sig, sig * e1], axis=1)
    return out, x


if __name__ == "__main__":
    # small shapes consistent with the module: d1 == d2 (e2 * e1), o = output dim
    B, d1, d2, o = 16, 32, 32, 8

    key = jax.random.PRNGKey(0)
    k1, k2, k3, k4 = jax.random.split(key, 4)
    e1 = jax.random.normal(k1, (B, d1), dtype=jnp.float32)
    e2 = jax.random.normal(k2, (B, d2), dtype=jnp.float32)
    U = jax.random.uniform(k3, (d1, K * o), minval=-1.0, maxval=1.0, dtype=jnp.float32)
    V = jax.random.uniform(k4, (d2, K * o), minval=-1.0, maxval=1.0, dtype=jnp.float32)

    # full kernel: returned concat + auxiliary pooled branch (bf16 matmuls)
    out, fused = lowfer_forward(e1, e2, U, V, o)
    jax.block_until_ready((out, fused))

    # production path: the pooled branch is dead in the reference return -> skip it
    out_fast, _ = lowfer_forward(e1, e2, U, V, o, compute_fused=False)
    jax.block_until_ready(out_fast)

    ref_out, ref_fused_f32 = reference(e1, e2, U, V, o)
    _, ref_fused_bf16 = reference(e1, e2, U, V, o, matmul_dtype=jnp.bfloat16)

    # the module's actual output is matmul-free -> tight tolerance
    assert jnp.allclose(out, ref_out, atol=1e-5, rtol=1e-5)
    assert jnp.allclose(out_fast, ref_out, atol=1e-5, rtol=1e-5)
    # auxiliary pooled output runs its matmuls in bf16: tight vs precision-matched
    # reference, loose vs the f32 reference.
    assert jnp.allclose(fused, ref_fused_bf16, atol=2e-3, rtol=2e-3)
    assert jnp.allclose(fused, ref_fused_f32, atol=5e-2, rtol=5e-2)

    print("KERNEL_OK")
</pallas_src>

<mosaic_0001>
module attributes {stable_mosaic.version = 11 : i64} {
  func.func @_fused_kernel(%arg0: i32, %arg1: i32, %arg2: memref<8x32xf32, #tpu.memory_space<vmem>>, %arg3: memref<8x32xf32, #tpu.memory_space<vmem>>, %arg4: memref<1x32x128xbf16, #tpu.memory_space<vmem>>, %arg5: memref<1x32x128xbf16, #tpu.memory_space<vmem>>, %arg6: memref<8x96xf32, #tpu.memory_space<vmem>>, %arg7: memref<8x128xf32, #tpu.memory_space<vmem>>, %arg8: memref<8x128xf32, #tpu.memory_space<vmem>>) attributes {dimension_semantics = [#tpu.dimension_semantics<parallel>, #tpu.dimension_semantics<arbitrary>], iteration_bounds = array<i64: 2, 30>, scalar_prefetch = 0 : i64, scratch_operands = 1 : i64, tpu.core_type = #tpu.core_type<tc>, window_params = [{transform_indices = @transform_0, window_bounds = array<i64: 8, 32>}, {transform_indices = @transform_1, window_bounds = array<i64: 8, 32>}, {transform_indices = @transform_2, window_bounds = array<i64: 1, 32, 128>}, {transform_indices = @transform_3, window_bounds = array<i64: 1, 32, 128>}, {transform_indices = @transform_4, window_bounds = array<i64: 8, 96>}, {transform_indices = @transform_5, window_bounds = array<i64: 8, 128>}]} {
    %c0_i32 = arith.constant 0 : i32
    %0 = arith.cmpi eq, %arg1, %c0_i32 : i32
    %1 = arith.extui %0 : i1 to i32
    %c0_i32_0 = arith.constant 0 : i32
    %2 = arith.cmpi ne, %1, %c0_i32_0 : i32
    scf.if %2 {
      %c0_16 = arith.constant 0 : index
      %c0_17 = arith.constant 0 : index
      %20 = vector.load %arg2[%c0_16, %c0_17] : memref<8x32xf32, #tpu.memory_space<vmem>>, vector<8x32xf32>
      %c0_18 = arith.constant 0 : index
      %c0_19 = arith.constant 0 : index
      %21 = vector.load %arg3[%c0_18, %c0_19] : memref<8x32xf32, #tpu.memory_space<vmem>>, vector<8x32xf32>
      %22 = arith.negf %21 : vector<8x32xf32>
      %23 = math.exp %22 : vector<8x32xf32>
      %cst_20 = arith.constant 1.000000e+00 : f32
      %24 = vector.broadcast %cst_20 : f32 to vector<8x32xf32>
      %25 = arith.addf %24, %23 : vector<8x32xf32>
      %26 = arith.divf %24, %25 : vector<8x32xf32>
      %c0_21 = arith.constant 0 : index
      %c0_22 = arith.constant 0 : index
      %27 = vector.load %arg6[%c0_21, %c0_22] : memref<8x96xf32, #tpu.memory_space<vmem>>, vector<8x32xf32>
      tpu.vector_store %arg6[%c0_21, %c0_22], %20 {strides = array<i32>} : memref<8x96xf32, #tpu.memory_space<vmem>>, vector<8x32xf32>,
      %c0_23 = arith.constant 0 : index
      %c32 = arith.constant 32 : index
      %28 = vector.load %arg6[%c0_23, %c32] : memref<8x96xf32, #tpu.memory_space<vmem>>, vector<8x32xf32>
      tpu.vector_store %arg6[%c0_23, %c32], %26 {strides = array<i32>} : memref<8x96xf32, #tpu.memory_space<vmem>>, vector<8x32xf32>,
      %29 = arith.mulf %26, %20 : vector<8x32xf32>
      %c0_24 = arith.constant 0 : index
      %c64 = arith.constant 64 : index
      %30 = vector.load %arg6[%c0_24, %c64] : memref<8x96xf32, #tpu.memory_space<vmem>>, vector<8x32xf32>
      tpu.vector_store %arg6[%c0_24, %c64], %29 {strides = array<i32>} : memref<8x96xf32, #tpu.memory_space<vmem>>, vector<8x32xf32>,
      %cst_25 = arith.constant 0.000000e+00 : f32
      %31 = vector.broadcast %cst_25 : f32 to vector<8x128xf32>
      %c0_26 = arith.constant 0 : index
      %c0_27 = arith.constant 0 : index
      %32 = vector.load %arg8[%c0_26, %c0_27] : memref<8x128xf32, #tpu.memory_space<vmem>>, vector<8x128xf32>
      tpu.vector_store %arg8[%c0_26, %c0_27], %31 {strides = array<i32>} : memref<8x128xf32, #tpu.memory_space<vmem>>, vector<8x128xf32>,
    } else {
    }
    %c0 = arith.constant 0 : index
    %c0_1 = arith.constant 0 : index
    %3 = vector.load %arg2[%c0, %c0_1] : memref<8x32xf32, #tpu.memory_space<vmem>>, vector<8x32xf32>
    %4 = arith.truncf %3 : vector<8x32xf32> to vector<8x32xbf16>
    %c0_2 = arith.constant 0 : index
    %c0_3 = arith.constant 0 : index
    %c0_4 = arith.constant 0 : index
    %5 = vector.load %arg4[%c0_2, %c0_3, %c0_4] : memref<1x32x128xbf16, #tpu.memory_space<vmem>>, vector<1x32x128xbf16>
    %6 = vector.shape_cast %5 : vector<1x32x128xbf16> to vector<32x128xbf16>
    %cst = arith.constant dense<0.000000e+00> : vector<8x128xf32>
    %7 = tpu.matmul %4, %6, %cst {dimension_numbers = #tpu.dot_dimension_numbers<[1], [0], [0], [1], [0, 0, 1, 1], [], []>} : vector<8x32xbf16>, vector<32x128xbf16>, vector<8x128xf32> -> vector<8x128xf32>
    %c0_5 = arith.constant 0 : index
    %c0_6 = arith.constant 0 : index
    %8 = vector.load %arg3[%c0_5, %c0_6] : memref<8x32xf32, #tpu.memory_space<vmem>>, vector<8x32xf32>
    %9 = arith.truncf %8 : vector<8x32xf32> to vector<8x32xbf16>
    %c0_7 = arith.constant 0 : index
    %c0_8 = arith.constant 0 : index
    %c0_9 = arith.constant 0 : index
    %10 = vector.load %arg5[%c0_7, %c0_8, %c0_9] : memref<1x32x128xbf16, #tpu.memory_space<vmem>>, vector<1x32x128xbf16>
    %11 = vector.shape_cast %10 : vector<1x32x128xbf16> to vector<32x128xbf16>
    %cst_10 = arith.constant dense<0.000000e+00> : vector<8x128xf32>
    %12 = tpu.matmul %9, %11, %cst_10 {dimension_numbers = #tpu.dot_dimension_numbers<[1], [0], [0], [1], [0, 0, 1, 1], [], []>} : vector<8x32xbf16>, vector<32x128xbf16>, vector<8x128xf32> -> vector<8x128xf32>
    %c0_11 = arith.constant 0 : index
    %c0_12 = arith.constant 0 : index
    %13 = vector.load %arg8[%c0_11, %c0_12] : memref<8x128xf32, #tpu.memory_space<vmem>>, vector<8x128xf32>
    %14 = arith.mulf %7, %12 : vector<8x128xf32>
    %15 = arith.addf %13, %14 : vector<8x128xf32>
    %c0_13 = arith.constant 0 : index
    %c0_14 = arith.constant 0 : index
    %16 = vector.load %arg8[%c0_13, %c0_14] : memref<8x128xf32, #tpu.memory_space<vmem>>, vector<8x128xf32>
    tpu.vector_store %arg8[%c0_13, %c0_14], %15 {strides = array<i32>} : memref<8x128xf32, #tpu.memory_space<vmem>>, vector<8x128xf32>,
    %c29_i32 = arith.constant 29 : i32
    %17 = arith.cmpi eq, %arg1, %c29_i32 : i32
    %18 = arith.extui %17 : i1 to i32
    %c0_i32_15 = arith.constant 0 : i32
    %19 = arith.cmpi ne, %18, %c0_i32_15 : i32
    scf.if %19 {
      %c0_16 = arith.constant 0 : index
      %c0_17 = arith.constant 0 : index
      %20 = vector.load %arg8[%c0_16, %c0_17] : memref<8x128xf32, #tpu.memory_space<vmem>>, vector<8x128xf32>
      %cst_18 = arith.constant 0.0333333351 : f32
      %21 = vector.broadcast %cst_18 : f32 to vector<8x128xf32>
      %22 = arith.mulf %20, %21 : vector<8x128xf32>
      %23 = arith.mulf %22, %22 : vector<8x128xf32>
      %cst_19 = arith.constant dense<0.000000e+00> : vector<8xf32>
      %24 = vector.multi_reduction <add>, %23, %cst_19 [1] : vector<8x128xf32> to vector<8xf32>
      %25 = vector.shape_cast %24 : vector<8xf32> to vector<8x1xf32>
      %26 = math.sqrt %25 : vector<8x1xf32>
      %cst_20 = arith.constant 9.99999996E-13 : f32
      %27 = vector.broadcast %cst_20 : f32 to vector<8x1xf32>
      %28 = arith.maximumf %26, %27 : vector<8x1xf32>
      %29 = vector.broadcast %28 : vector<8x1xf32> to vector<8x128xf32>
      %30 = arith.divf %22, %29 : vector<8x128xf32>
      %c0_21 = arith.constant 0 : index
      %c0_22 = arith.constant 0 : index
      %31 = vector.load %arg7[%c0_21, %c0_22] : memref<8x128xf32, #tpu.memory_space<vmem>>, vector<8x128xf32>
      tpu.vector_store %arg7[%c0_21, %c0_22], %30 {strides = array<i32>} : memref<8x128xf32, #tpu.memory_space<vmem>>, vector<8x128xf32>,
    } else {
    }
    return
  }
  func.func @transform_0(%arg0: i32, %arg1: i32) -> (i32, i32) {
    %c0_i32 = arith.constant 0 : i32
    %c0_i32_0 = arith.constant 0 : i32
    return %arg0, %c0_i32 : i32, i32
  }
  func.func @transform_1(%arg0: i32, %arg1: i32) -> (i32, i32) {
    %c0_i32 = arith.constant 0 : i32
    %c0_i32_0 = arith.constant 0 : i32
    return %arg0, %c0_i32 : i32, i32
  }
  func.func @transform_2(%arg0: i32, %arg1: i32) -> (i32, i32, i32) {
    %c0_i32 = arith.constant 0 : i32
    %c0_i32_0 = arith.constant 0 : i32
    %c0_i32_1 = arith.constant 0 : i32
    return %arg1, %c0_i32, %c0_i32_0 : i32, i32, i32
  }
  func.func @transform_3(%arg0: i32, %arg1: i32) -> (i32, i32, i32) {
    %c0_i32 = arith.constant 0 : i32
    %c0_i32_0 = arith.constant 0 : i32
    %c0_i32_1 = arith.constant 0 : i32
    return %arg1, %c0_i32, %c0_i32_0 : i32, i32, i32
  }
  func.func @transform_4(%arg0: i32, %arg1: i32) -> (i32, i32) {
    %c0_i32 = arith.constant 0 : i32
    %c0_i32_0 = arith.constant 0 : i32
    return %arg0, %c0_i32 : i32, i32
  }
  func.func @transform_5(%arg0: i32, %arg1: i32) -> (i32, i32) {
    %c0_i32 = arith.constant 0 : i32
    %c0_i32_0 = arith.constant 0 : i32
    return %arg0, %c0_i32 : i32, i32
  }
}

</mosaic_0001>

<bundles_post_ra>
// kernel: tpu_custom_call.1
= control target key start
LH: loop header
LB: loop body
LE: loop exit
PB: predicated region body
PF: predicated region fallthrough
CT: control target
= control target key end

     0   :  { %s1765_s0 = inlined_call_operand.hbm [shape: f32[16,32], index: 0, kind: input, shape index: {}]   ;;  %s1766_s1 = inlined_call_operand.hbm [shape: f32[16,32], index: 1, kind: input, shape index: {}]   ;;  %s1767_s2 = inlined_call_operand.hbm [shape: bf16[30,32,128], index: 2, kind: input, shape index: {}]   ;;  %s1768_s3 = inlined_call_operand.hbm [shape: bf16[30,32,128], index: 3, kind: input, shape index: {}]   ;;  %s1769_s4 = inlined_call_operand.hbm [shape: f32[16,96], index: 4, kind: output, shape index: {0}]   ;;  %s1770_s5 = inlined_call_operand.hbm [shape: f32[16,128], index: 5, kind: output, shape index: {1}]  }
   0x1   :  { %1786 = sst [smem:[#allocation28_spill]] %s1766_s1 }
   0x2   :  { %1787 = sst [smem:[#allocation29_spill]] %s1769_s4 }
   0x3   :  { %1788 = sst [smem:[#allocation30_spill]] %s1770_s5 }
   0x4   :  { %11 = vsyncpa [#allocation4], 0 }
   0x5   :  { %13 = vsyncpa [#allocation4 + $0x1], 0 }
   0x6   :  { %14 = vsyncpa [#allocation7], 0 }
   0x7   :  { %16 = vsyncpa [#allocation7 + $0x1], 0 }
   0x8   :  { %17 = vsyncpa [#allocation10], 0 }
   0x9   :  { %19 = vsyncpa [#allocation10 + $0x1], 0 }
   0xa   :  { %20 = vsyncpa [#allocation5], 0 }
   0xb   :  { %22 = vsyncpa [#allocation5 + $0x1], 0 }
   0xc   :  { %23 = vsyncpa [#allocation13], 0 }
   0xd   :  { %25 = vsyncpa [#allocation13 + $0x1], 0  ;;  %s1296_s18 = smov 0   ;;  %s1298_s19 = smov 0  }
   0xe   :  { %s1300_s20 = smov 0   ;;  %s1302_s21 = smov 0  }
   0xf   :  { %s1304_s22 = smov 0   ;;  %s1306_s23 = smov 0  }
  0x10   :  { %s1308_s24 = smov 0   ;;  %s1310_s25 = smov 0  }
  0x11   :  { %s1312_s26 = smov 0   ;;  %s1314_s27 = smov 0  }
  0x12   :  { %s1316_s28 = smov 0  }
  0x13 LB: > { %1789 = sst [smem:[#allocation20_spill]] %s1223_s21  ;;  %s1352_s29 = sadd.s32 4294967295, %s1251_s28   ;;  %s1251_s28 = sphi %s1316_s28, %s31_s28   ;;  %s1247_s27 = sphi %s1314_s27, %s1834_s27   ;;  %s1243_s26 = sphi %s1312_s26, %s1833_s26   ;;  %s1239_s25 = sphi %s1310_s25, %s1823_s25   ;;  %s1235_s24 = sphi %s1308_s24, %s1832_s24   ;;  %s1231_s23 = sphi %s1306_s23, %s1831_s23   ;;  %s1227_s22 = sphi %s1304_s22, %s1830_s22   ;;  %s1223_s21 = sphi %s1302_s21, %s1829_s21   ;;  %s1219_s20 = sphi %s1300_s20, %s1828_s20   ;;  %s1215_s19 = sphi %s1298_s19, %s1827_s19   ;;  %s1211_s18 = sphi %s1296_s18, %s1826_s18  }
  0x14   : > { %1790 = sst [smem:[#allocation21_spill]] %s1247_s27  ;;  %s765_s30 = sadd.s32 4294967294, %s1251_s28  }
  0x15   : > { %1791 = sst [smem:[#allocation22_spill]] %s1251_s28  ;;  %s40_s6 = sadd.s32 1, %s1243_s26 }
  0x16   : > { %s43_s7 = sadd.s32 1, %s1247_s27  ;;  %p41_p0 = scmp.ge.s32.totalorder %s40_s6, 30 }
  0x17   : > { %s50_s8 = sadd.s32 1, %s1231_s23  ;;  %p57_p1 = scmp.ne.s32.totalorder %s1231_s23, %s1227_s22 }
  0x18   : > { %p58_p2 = scmp.eq.s32.totalorder %s1251_s28, 0  ;;  %s1836_s6 = smov (%p41_p0, %s40_s6), 0 }
  0x19   : > { %1792 = sst [smem:[#allocation23_spill]] %s1836_s6  ;;  %s1838_s7 = smov (!%p41_p0, %s43_s7), %s1247_s27 }
  0x1a   : > { %p1369_p3 = por %p58_p2, %p57_p1  ;;  %p1771_p4 = scmp.ne.s32.totalorder %s1227_s22, %s1223_s21 }
  0x1b   : > { %p45_p5 = scmp.ge.s32.totalorder %s1838_s7, 2  ;;  %p64_p6 = scmp.eq.s32.totalorder %s1352_s29, 0 }
  0x1c   : > { %s99_s10 = ssub.s32 %s1243_s26, %s1836_s6  ;;  %s102_s11 = sadd.s32 1, %s1219_s20 }
  0x1d   : > { %s1840_s7 = smov (%p45_p5, %s1838_s7), 0  ;;  %p1386_p7 = por %p64_p6, %p1771_p4 }
  0x1e   : > { %1794 = sst [smem:[#allocation24_spill]] %s1840_s7  ;;  %p100_p8 = scmp.eq.s32.totalorder %s99_s10, 0 }
  0x1f   : > { %s1795_s12 = scalar_select %p1386_p7, 1, 0 }
  0x20   : > { %s47_s13 = ssub.s32 %s1247_s27, %s1840_s7  ;;  %p109_p9 = scmp.ne.s32.totalorder %s1219_s20, %s1215_s19 }
  0x21   : > { %p48_p10 = scmp.eq.s32.totalorder %s47_s13, 0  ;;  %p115_p11 = scmp.ne.s32.totalorder %s1215_s19, %s1211_s18 }
  0x22   : > { %s1397_s14 = scalar_select %p100_p8, %s1219_s20, %s102_s11  }
  0x23   : > { %s1400_s15 = scalar_select %p48_p10, %s1231_s23, %s50_s8  }
  0x24   : > { %1796 = sst [smem:[#allocation25_spill]] %s1397_s14  ;;  %p1404_p12 = por %p109_p9, %p58_p2 }
  0x25   : > { %1797 = sst [smem:[#allocation26_spill]] %s1400_s15  ;;  %p1410_p13 = por %p115_p11, %p64_p6 }
  0x26   : > { %p165_p0 = scmp.eq.s32.totalorder %s1352_s29, 59  ;;  %p171_p5 = scmp.eq.s32.totalorder %s765_s30, 59 }
  0x27   : > { %s1799_s17 = scalar_select %p1410_p13, 1, 0 }
  0x28   : > { %p856_p4 = scmp.lt.s32.totalorder %s1251_s28, 60  ;;  %p1419_p7 = por %p165_p0, %p57_p1 }
  0x29   : > { %p1801_p8 = scmp.ne.s32.totalorder %s1227_s22, %s1223_s21  ;;  %s1775_s10 = sand.u32 1, %s1231_s23  }
  0x2a   : > { %s1800_s18 = scalar_select %p1419_p7, 1, 0 }
  0x2b   : > { %p1426_p10 = por %p171_p5, %p1801_p8  ;;  %s1779_s11 = sshll.u32 %s1247_s27, 7 }
  0x2c   : > { %s1434_s13 = sshll.u32 %s1775_s10, 3  ;;  %p1438_p2 = pnand %p856_p4, %p1369_p3 }
  0x2d   : > { %s1802_s8 = scalar_select %p1426_p10, 1, 0 }
  0x2e   : > { %s235_s7 = sand.u32 1, %s1251_s28   ;;  %s1805_s1 = sld [smem:[#allocation28_spill]] }
  0x2f   : > { %1803 = sst [smem:[#allocation27_spill]] %s1802_s8  ;;  %s239_s10 = scalar_lea.vmem [#allocation6], %s1434_s13 }
  0x30   : > { %s246_s9 = sshll.u32 %s239_s10, 4  ;;  %p1455_p1 = pnand %p856_p4, %p1404_p12  ;;  %s1451_s9 = int_to_ptr.vmem [resolvable:$true] %s246_s9 }
  0x31   : > { %s1459_s21 = scalar_lea.sflag [#allocation7], %s235_s7  ;;  %p967_p6 = pneg %p1438_p2 }
  0x34   : > { %s1448_s14 = scalar_lea.hbm %s1805_s1, %s1779_s11  ;;  %s970_s10 = scalar_lea.hbm %s1805_s1, 256 }
  0x35   : > { %s965_s5 = scalar_lea.hbm %s1448_s14, 128  ;;  %p971_p4 = scmp.lt.u32.totalorder %s1448_s14, %s1805_s1 }
  0x36   : > { %p966_p3 = scmp.ne.s32.totalorder %s1448_s14, %s965_s5  ;;  %p972_p12 = scmp.lt.u32.totalorder %s970_s10, %s965_s5 }
  0x37   : > { %p974_p5 = scmp.lt.u32.totalorder %s965_s5, %s1448_s14 }
  0x38   : > { %p968_p9 = pnand %p967_p6, %p966_p3  ;;  %p973_p0 = por %p972_p12, %p971_p4 }
  0x3a   : > { %p969_p11 = pneg %p968_p9  ;;  %p975_p8 = por %p974_p5, %p973_p0 }
  0x3c   : > { %p976_p10 = pnand %p975_p8, %p969_p11 }
  0x3e   : > { %979 = shalt.err (!%p976_p10)
}
  0x3f   : > { %s980_s7 = scalar_lea.vmem %s1451_s9, 128  ;;  %s1253_s6 = smov [#allocation6]  }
  0x40   : > { %p981_p3 = scmp.ne.s32.totalorder %s1451_s9, %s980_s7  ;;  %s985_s15 = sshll.u32 %s1253_s6, 4  ;;  %s986_s15 = int_to_ptr.vmem [resolvable:$false] %s985_s15 }
  0x41   : > { %s987_s11 = scalar_lea.vmem %s986_s15, 256  ;;  %p988_p13 = scmp.lt.s32.totalorder %s1451_s9, %s986_s15 }
  0x42   : > { %p983_p9 = pnand %p981_p3, %p967_p6  ;;  %p989_p4 = scmp.lt.s32.totalorder %s987_s11, %s980_s7 }
  0x44   : > { %p984_p7 = pneg %p983_p9  ;;  %p990_p12 = por %p989_p4, %p988_p13 }
  0x46   : > { %p991_p0 = pnand %p990_p12, %p984_p7 }
  0x48   : > { %994 = shalt.err (!%p991_p0)
}
  0x49   : > { %842 = dma.hbm_to_vmem [thread:$0]  (!%p1438_p2), %s1448_s14, 128, %s1451_s9, %s1459_s21  }
  0x4a   : > { %p778_p10 = scmp.ge.s32.totalorder %s1251_s28, 1  ;;  %p293_p11 = scmp.lt.s32.totalorder %s1251_s28, 61 }
  0x4b   : > { %s1808_s10 = sshll.u32 %s1247_s27, 7  ;;  %s221_s15 = scalar_lea.vmem [#allocation3], %s1434_s13 }
  0x4c   : > { %p1489_p5 = pnand %p778_p10, %p293_p11  ;;  %s1498_s6 = scalar_lea.hbm %s1765_s0, %s1808_s10 }
  0x4d   : > { %s228_s11 = sshll.u32 %s221_s15, 4  ;;  %s255_s14 = sand.u32 1, %s1219_s20   ;;  %s1501_s11 = int_to_ptr.vmem [resolvable:$true] %s228_s11 }
  0x4e   : > { %s1807_s5 = scalar_select %p1489_p5, 1, 0 }
  0x4f   : > { %s1809_s9 = sand.u32 1, %s1231_s23   ;;  %s995_s28 = scalar_lea.hbm %s1498_s6, 128 }
  0x50   : > { %s218_s1 = scalar_lea.sflag [#allocation4], %s1809_s9  ;;  %p996_p7 = scmp.ne.s32.totalorder %s1498_s6, %s995_s28 }
  0x51   : > { %s1000_s7 = scalar_lea.hbm %s1765_s0, 256  ;;  %p1001_p3 = scmp.lt.u32.totalorder %s1498_s6, %s1765_s0 }
  0x52   : > { %p998_p13 = pnand %p996_p7, %p967_p6  ;;  %p1002_p9 = scmp.lt.u32.totalorder %s1000_s7, %s995_s28 }
  0x53   : > { %p1004_p12 = scmp.lt.u32.totalorder %s995_s28, %s1498_s6 }
  0x54   : > { %p999_p8 = pneg %p998_p13  ;;  %p1003_p4 = por %p1002_p9, %p1001_p3 }
  0x56   : > { %p1005_p0 = por %p1004_p12, %p1003_p4 }
  0x58   : > { %p1006_p10 = pnand %p1005_p0, %p999_p8 }
  0x5a   : > { %1009 = shalt.err (!%p1006_p10)
}
  0x5b   : > { %s1010_s13 = scalar_lea.vmem %s1501_s11, 128  ;;  %s1254_s15 = smov [#allocation3]  }
  0x5c   : > { %p1011_p11 = scmp.ne.s32.totalorder %s1501_s11, %s1010_s13  ;;  %s1015_s9 = sshll.u32 %s1254_s15, 4  ;;  %s1016_s9 = int_to_ptr.vmem [resolvable:$false] %s1015_s9 }
  0x5d   : > { %s1017_s4 = scalar_lea.vmem %s1016_s9, 256  ;;  %p1018_p5 = scmp.lt.s32.totalorder %s1501_s11, %s1016_s9 }
  0x5e   : > { %p1013_p7 = pnand %p1011_p11, %p967_p6  ;;  %p1019_p3 = scmp.lt.s32.totalorder %s1017_s4, %s1010_s13 }
  0x60   : > { %p1014_p13 = pneg %p1013_p7  ;;  %p1020_p9 = por %p1019_p3, %p1018_p5 }
  0x62   : > { %p1021_p4 = pnand %p1020_p9, %p1014_p13 }
  0x64   : > { %1024 = shalt.err (!%p1021_p4)
}
  0x65   : > { %839 = dma.hbm_to_vmem [thread:$0]  (!%p1438_p2), %s1498_s6, 128, %s1501_s11, %s218_s1  }
  0x66   : > { %s1531_s27 = sshll.u32 %s255_s14, 4  ;;  %s800_s28 = sshll.u32 %s1243_s26, 8 }
  0x67   : > { %s1539_s7 = scalar_lea.hbm %s1767_s2, %s800_s28  ;;  %s257_s30 = scalar_lea.vmem [#allocation8], %s1531_s27 }
  0x68   : > { %s264_s13 = sshll.u32 %s257_s30, 4  ;;  %s1025_s1 = scalar_lea.hbm %s1539_s7, 256  ;;  %s1542_s13 = int_to_ptr.vmem [resolvable:$true] %s264_s13 }
  0x69   : > { %p1026_p2 = scmp.ne.s32.totalorder %s1539_s7, %s1025_s1  ;;  %p1027_p6 = pneg %p1455_p1 }
  0x6a   : > { %s1030_s15 = scalar_lea.hbm %s1767_s2, 7680  ;;  %p1031_p12 = scmp.lt.u32.totalorder %s1539_s7, %s1767_s2 }
  0x6b   : > { %p1028_p5 = pnand %p1027_p6, %p1026_p2  ;;  %p1032_p0 = scmp.lt.u32.totalorder %s1030_s15, %s1025_s1 }
  0x6c   : > { %p1034_p11 = scmp.lt.u32.totalorder %s1025_s1, %s1539_s7 }
  0x6d   : > { %p1029_p8 = pneg %p1028_p5  ;;  %p1033_p10 = por %p1032_p0, %p1031_p12 }
  0x6f   : > { %p1035_p7 = por %p1034_p11, %p1033_p10 }
  0x71   : > { %p1036_p13 = pnand %p1035_p7, %p1029_p8 }
  0x73   : > { %1039 = shalt.err (!%p1036_p13)
}
  0x74   : > { %s1040_s16 = scalar_lea.vmem %s1542_s13, 256  ;;  %s1255_s10 = smov [#allocation8]  }
  0x75   : > { %p1041_p3 = scmp.ne.s32.totalorder %s1542_s13, %s1040_s16  ;;  %s1045_s30 = sshll.u32 %s1255_s10, 4  ;;  %s1046_s30 = int_to_ptr.vmem [resolvable:$false] %s1045_s30 }
  0x76   : > { %s1047_s6 = scalar_lea.vmem %s1046_s30, 512  ;;  %p1048_p2 = scmp.lt.s32.totalorder %s1542_s13, %s1046_s30 }
  0x77   : > { %p1043_p9 = pnand %p1041_p3, %p1027_p6  ;;  %p1049_p5 = scmp.lt.s32.totalorder %s1047_s6, %s1040_s16 }
  0x79   : > { %p1044_p4 = pneg %p1043_p9  ;;  %p1050_p12 = por %p1049_p5, %p1048_p2 }
  0x7b   : > { %p1051_p0 = pnand %p1050_p12, %p1044_p4 }
  0x7d   : > { %1054 = shalt.err (!%p1051_p0)
}
  0x7e   : > { %s1256_s1 = smov 64   ;;  %s1257_s11 = smov 4  }
  0x7f   : > { %845 = dma.hbm_to_vmem [thread:$0]  (!%p1455_p1), %s1539_s7, 256, %s1542_s13, %s1459_s21, %s1256_s1, %s1256_s1, %s1257_s11  }
  0x80   : > { %s1578_s4 = scalar_lea.hbm %s1768_s3, %s800_s28  ;;  %s278_s16 = scalar_lea.vmem [#allocation9], %s1531_s27 }
  0x81   : > { %s285_s10 = sshll.u32 %s278_s16, 4  ;;  %s1585_s30 = scalar_lea.sflag [#allocation10], %s255_s14  ;;  %s1581_s10 = int_to_ptr.vmem [resolvable:$true] %s285_s10 }
  0x82   : > { %s1055_s6 = scalar_lea.hbm %s1578_s4, 256  ;;  %s1060_s7 = scalar_lea.hbm %s1768_s3, 7680 }
  0x83   : > { %p1056_p8 = scmp.ne.s32.totalorder %s1578_s4, %s1055_s6  ;;  %p1061_p7 = scmp.lt.u32.totalorder %s1578_s4, %s1768_s3 }
  0x84   : > { %p1062_p13 = scmp.lt.u32.totalorder %s1060_s7, %s1055_s6  ;;  %p1064_p9 = scmp.lt.u32.totalorder %s1055_s6, %s1578_s4 }
  0x85   : > { %p1058_p10 = pnand %p1056_p8, %p1027_p6 }
  0x86   : > { %p1063_p3 = por %p1062_p13, %p1061_p7 }
  0x87   : > { %p1059_p11 = pneg %p1058_p10 }
  0x88   : > { %p1065_p4 = por %p1064_p9, %p1063_p3 }
  0x8a   : > { %p1066_p2 = pnand %p1065_p4, %p1059_p11 }
  0x8c   : > { %1069 = shalt.err (!%p1066_p2)
}
  0x8d   : > { %s1070_s14 = scalar_lea.vmem %s1581_s10, 256  ;;  %s1258_s27 = smov [#allocation9]  }
  0x8e   : > { %p1071_p5 = scmp.ne.s32.totalorder %s1581_s10, %s1070_s14  ;;  %s1075_s9 = sshll.u32 %s1258_s27, 4  ;;  %s1076_s9 = int_to_ptr.vmem [resolvable:$false] %s1075_s9 }
  0x8f   : > { %s1077_s16 = scalar_lea.vmem %s1076_s9, 512  ;;  %p1078_p8 = scmp.lt.s32.totalorder %s1581_s10, %s1076_s9 }
  0x90   : > { %p1073_p12 = pnand %p1071_p5, %p1027_p6  ;;  %p1079_p10 = scmp.lt.s32.totalorder %s1077_s16, %s1070_s14 }
  0x92   : > { %p1074_p0 = pneg %p1073_p12  ;;  %p1080_p7 = por %p1079_p10, %p1078_p8 }
  0x94   : > { %p1081_p13 = pnand %p1080_p7, %p1074_p0 }
  0x96   : > { %1084 = shalt.err (!%p1081_p13)
}
  0x97   : > { %848 = dma.hbm_to_vmem [thread:$0]  (!%p1455_p1), %s1578_s4, 256, %s1581_s10, %s1585_s30, %s1256_s1, %s1256_s1, %s1257_s11  }
  0x98   : > { %p1810_p6 = scmp.ne.s32.totalorder %s1807_s5, 0 }
  0x99   : > { %s1617_s6 = sand.u32 (!%p1810_p6), 1, %s1227_s22   ;;  %p1811_p11 = scmp.ne.s32.totalorder (!%p1810_p6), %s1795_s12, 0 }
  0x9a   : > { %297 = sbr.rel (%p1810_p6) target bundleno = 781 (0x30d), region = 36  ;;  %s1620_s21 = sshll.u32 (!%p1810_p6), %s1617_s6, 3 }
  0x9b   : > { %s300_s8 = scalar_lea.sflag (!%p1810_p6), [#allocation4], %s1617_s6  ;;  %s303_s28 = scalar_lea.vmem (!%p1810_p6), [#allocation3], %s1620_s21 }
  0xa1   : > { %1186 = dma.done.wait (%p1811_p11), %s300_s8, 128  }
  0xa2   : > { %1188 = vsyncadd (%p1811_p11), %s300_s8, 4294967168  ;;  %s308_s5 = sand.u32 1, %s1352_s29   ;;  %s312_s11 = scalar_lea.vmem [#allocation6], %s1620_s21 }
  0xa3   : > { %s309_s1 = scalar_lea.sflag [#allocation7], %s308_s5 }
  0xa4   : > { %1190 = dma.done.wait (%p1811_p11), %s309_s1, 128  }
  0xa5   : > { %1192 = vsyncadd (%p1811_p11), %s309_s1, 4294967168  ;;  %s319_s4 = sand.u32 1, %s1215_s19   ;;  %p1812_p1 = scmp.ne.s32.totalorder %s1799_s17, 0 }
  0xa6   : > { %s1635_s10 = sshll.u32 %s319_s4, 4 }
  0xa7   : > { %s321_s30 = scalar_lea.vmem [#allocation8], %s1635_s10 }
  0xa8   : > { %1194 = dma.done.wait (%p1812_p1), %s309_s1, 256  }
  0xa9   : > { %1196 = vsyncadd (%p1812_p1), %s309_s1, 4294967040  ;;  %s327_s29 = scalar_lea.sflag [#allocation10], %s319_s4  ;;  %s330_s7 = scalar_lea.vmem [#allocation9], %s1635_s10 }
  0xaa   : > { %1198 = dma.done.wait (%p1812_p1), %s327_s29, 256  }
  0xab   : > { %1200 = vsyncadd (%p1812_p1), %s327_s29, 4294967040  ;;  %s1648_s12 = scalar_lea.vmem [#allocation11], %s1620_s21  ;;  %s376_s13 = scalar_lea.vmem [#allocation12], %s1620_s21 }
  0xac   : > { %p785_p3 = scmp.ne.s32.totalorder %s1235_s24, 0 }
  0xad   : > { %v383_v0 = vld [vmem:[%s312_s11] sm:$0xff] (!%p785_p3)  ;;  %v382_v1 = vld [vmem:[%s303_s28] sm:$0xff] (!%p785_p3)  ;;  %vm390_vm0 = vcmask (!%p785_p3), 261120   ;;  %v1259_v5 = vmov (!%p785_p3), 0.0   ;;  %s1260_s17 = smov (!%p785_p3), 32   ;;  %s1261_s15 = smov (!%p785_p3), 64  }
  0xae   : > { %381 = sbr.rel (%p785_p3) target bundleno = 320 (0x140), region = 56  ;;  %v786_v2 = vmul.f32 (!%p785_p3), -1.442695, %v383_v0  ;;  %391 = vst.msk [vmem:[%s1648_s12] sm:$0xff] (!%p785_p3), %vm390_vm0, %v382_v1  ;;  %405 = vst [vmem:[#allocation2] sm:$0xff] (!%p785_p3), %v1259_v5  ;;  %vm396_vm1 = vcmask (!%p785_p3), 523520  }
  0xaf   : > { %vm403_vm2 = vcmask (!%p785_p3), 785920  }
  0xb0   : > { %953 = vpow2.f32 (!%p785_p3), %v786_v2 }
  0xba   : > { %v954_v3 = vpop.eup %953 }
  0xbb   : > { %v387_v4 = vadd.f32 1.0, %v954_v3 }
  0xbd   : > { %955 = vrcp.f32 %v387_v4 }
  0xc7   : > { %v956_v6 = vpop.eup %955 }
  0xc8   : > { %393 = vrot.lane.b32.xlu0 %v956_v6, %s1260_s17  ;;  %v398_v7 = vmul.f32 %v956_v6, %v382_v1 }
  0xcc   : > { %400 = vrot.lane.b32.xlu0 %v398_v7, %s1261_s15 }
 0x13a   : > { %v394_v8 = vpop.permute.xlu0 %393 }
 0x13b   : > { %397 = vst.msk [vmem:[%s1648_s12] sm:$0xff] %vm396_vm1, %v394_v8 }
 0x13e   : > { %v401_v9 = vpop.permute.xlu0 %400 }
 0x13f   : > { %404 = vst.msk [vmem:[%s1648_s12] sm:$0xff] %vm403_vm2, %v401_v9 }
 0x140 PF: > { %v957_v10 = vld [vmem:[%s321_s30] sm:$0xff]   ;;  %v1262_v11 = vmov 0.0   ;;  %v959_v13 = vld [vmem:[%s321_s30 + $0x8] sm:$0xff]   ;;  %vm1263_vm3 = vmmov 0   ;;  %vm424_vm4 = vcmask 261120   ;;  %p793_p9 = scmp.ne.s32.totalorder %s1235_s24, 29 }
 0x141   : > { %808 = vmatprep.subr.bf16.mxu0 %v1262_v11  ;;  %816 = vmatprep.subr.bf16.mxu1 %v1262_v11  ;;  %v958_v12 = vld [vmem:[%s330_s7] sm:$0xff]   ;;  %v960_v14 = vld [vmem:[%s330_s7 + $0x8] sm:$0xff]  }
 0x142   : > { %809 = vmatpush3.bf16.msra.mxu0 %v957_v10  ;;  %812 = vmatprep.mubr.msk.bf16.mxu0 %vm1263_vm3, %v1262_v11  ;;  %v406_v15 = vld [vmem:[%s303_s28] sm:$0xff]  ;;  %v468_v16 = vld [vmem:[%s312_s11] sm:$0xff] }
 0x143   : > { %817 = vmatpush3.bf16.msra.mxu1 %v958_v12  ;;  %810 = vmatprep.subr.bf16.mxu0 %v1262_v11  ;;  %v407_v17 = vpack.c.bf16 %v406_v15, %v406_v15  ;;  %v469_v18 = vpack.c.bf16 %v468_v16, %v468_v16  ;;  %v529_v21 = vld [vmem:[#allocation2] sm:$0xff] }
 0x144   : > { %818 = vmatprep.subr.bf16.mxu1 %v1262_v11  ;;  %820 = vmatprep.mubr.msk.bf16.mxu1 %vm1263_vm3, %v1262_v11 }
 0x146   : > { %811 = vmatpush3.bf16.msra.mxu0 %v959_v13 }
 0x147   : > { %819 = vmatpush3.bf16.msra.mxu1 %v960_v14 }
 0x149   : > { %813 = vmatmul.mubr.msk.bf16.vlgmr.msra.gmra.mrb[0].mxu0 %vm424_vm4, %v407_v17 }
 0x14a   : > { %821 = vmatmul.mubr.msk.bf16.vlgmr.msra.gmra.mrb[0].mxu1 %vm424_vm4, %v469_v18 }
 0x21c   : > { %v462_v19 = vpop.f32.mrb[0].mxu0  ;;  %536 = sbr.rel (%p793_p9) target bundleno = 731 (0x2db), region = 60 }
 0x21d   : > { %v523_v20 = vpop.f32.mrb[0].mxu1  ;;  %v814_v22 = vpop.f32.mrb[1].mxu0 }
 0x21e   : > { %v530_v23 = vmul.f32 %v523_v20, %v462_v19  ;;  %v822_v24 = vpop.f32.mrb[1].mxu1  ;;  %v465_v25 = vpop.f32.mrb[2].mxu0 }
 0x21f   : > { %v526_v26 = vpop.f32.mrb[2].mxu1  ;;  %v815_v27 = vpop.f32.mrb[3].mxu0 }
 0x220   : > { %v531_v28 = vadd.f32 %v530_v23, %v529_v21  ;;  %v823_v29 = vpop.f32.mrb[3].mxu1 }
 0x222   : > { %532 = vst [vmem:[#allocation2] sm:$0xff] %v531_v28 }
 0x229   : > { %v537_v30 = vld [vmem:[#allocation2] sm:$0xff] }
 0x22a   : > { %v538_v31 = vmul.f32 0.033333335, %v537_v30 }
 0x22c   : > { %v539_v32 = vmul.f32 %v538_v31, %v538_v31 }
 0x22e   : > { %540 = vadd.xlane.f32.xlu0 %v539_v32 }
 0x2bb   : > { %v541_v33 = vpop.xlane.xlu0 %540 }
 0x2bc   : > { %961 = vrsqrt.f32 %v541_v33  ;;  %vm544_vm5 = vcmp.eq.f32.partialorder %v541_v33, inf  ;;  %v547_v36 = vand.u32 2147483648, %v541_v33  ;;  %vm546_vm6 = vcmp.eq.f32.partialorder %v541_v33, 0.0 }
 0x2c6   : > { %v962_v34 = vpop.eup %961 }
 0x2c7   : > { %v543_v35 = vmul.f32 %v962_v34, %v541_v33 }
 0x2c9   : > { %v545_v37 = vsel %vm544_vm5, %v541_v33, %v543_v35 }
 0x2ca   : > { %v548_v38 = vsel %vm546_vm6, %v547_v36, %v545_v37 }
 0x2cb   : > { %v549_v39 = vmax.f32 %v548_v38, 1e-12 }
 0x2cd   : > { %963 = vrcp.f32 %v549_v39 }
 0x2d7   : > { %v964_v40 = vpop.eup %963 }
 0x2d8   : > { %v551_v41 = vmul.f32 %v964_v40, %v538_v31 }
 0x2da   : > { %552 = vst [vmem:[%s376_s13] sm:$0xff] %v551_v41 }
 0x2db PF: > { %s796_s24 = sshll.u32 %s1239_s25, 7  ;;  %s1813_s9 = sld [smem:[#allocation29_spill]] }
 0x2dc   : > { %s572_s8 = sshll.u32 %s1648_s12, 4  ;;  %s554_s28 = scalar_lea.sflag [#allocation5], %s1617_s6  ;;  %s573_s8 = int_to_ptr.vmem [resolvable:$true] %s572_s8 }
 0x2dd   : > { %s1085_s5 = scalar_lea.vmem %s573_s8, 128  ;;  %p1814_p2 = scmp.ne.s32.totalorder %s1800_s18, 0 }
 0x2de   : > { %p1086_p4 = scmp.ne.s32.totalorder %s573_s8, %s1085_s5  ;;  %s1264_s1 = smov [#allocation11]  }
 0x2df   : > { %s1089_s11 = sshll.u32 %s1264_s1, 4  ;;  %s1090_s11 = int_to_ptr.vmem [resolvable:$false] %s1089_s11 }
 0x2e0   : > { %p1087_p5 = pnand %p1086_p4, %p1814_p2  ;;  %s1091_s4 = scalar_lea.vmem %s1090_s11, 256 }
 0x2e1   : > { %s1680_s16 = scalar_lea.hbm %s1813_s9, %s796_s24  ;;  %p1092_p0 = scmp.lt.s32.totalorder %s573_s8, %s1090_s11 }
 0x2e2   : > { %p1088_p12 = pneg %p1087_p5  ;;  %p1093_p8 = scmp.lt.s32.totalorder %s1091_s4, %s1085_s5 }
 0x2e4   : > { %p1094_p10 = por %p1093_p8, %p1092_p0 }
 0x2e6   : > { %p1095_p7 = pnand %p1094_p10, %p1088_p12 }
 0x2e8   : > { %1098 = shalt.err (!%p1095_p7)
}
 0x2e9   : > { %s1099_s10 = scalar_lea.hbm %s1680_s16, 128  ;;  %s1103_s7 = scalar_lea.hbm %s1813_s9, 256 }
 0x2ea   : > { %p1100_p13 = scmp.ne.s32.totalorder %s1680_s16, %s1099_s10  ;;  %p1104_p1 = scmp.lt.u32.totalorder %s1680_s16, %s1813_s9 }
 0x2eb   : > { %p1105_p3 = scmp.lt.u32.totalorder %s1103_s7, %s1099_s10  ;;  %p1107_p4 = scmp.lt.u32.totalorder %s1099_s10, %s1680_s16 }
 0x2ec   : > { %p1101_p6 = pnand %p1100_p13, %p1814_p2 }
 0x2ed   : > { %p1106_p9 = por %p1105_p3, %p1104_p1 }
 0x2ee   : > { %p1102_p11 = pneg %p1101_p6 }
 0x2ef   : > { %p1108_p5 = por %p1107_p4, %p1106_p9 }
 0x2f1   : > { %p1109_p12 = pnand %p1108_p5, %p1102_p11 }
 0x2f3   : > { %1112 = shalt.err (!%p1109_p12)
}
 0x2f4   : > { %832 = dma.vmem_to_hbm [thread:$0]  (%p1814_p2), %s573_s8, 128, %s1680_s16, %s554_s28  }
 0x2f5   : > { %s1815_s27 = sld [smem:[#allocation30_spill]]  ;;  %s585_s11 = sshll.u32 %s376_s13, 4  ;;  %s586_s11 = int_to_ptr.vmem [resolvable:$true] %s585_s11 }
 0x2f6   : > { %s559_s4 = scalar_lea.sflag [#allocation13], %s1617_s6  ;;  %s1113_s10 = scalar_lea.vmem %s586_s11, 128 }
 0x2f7   : > { %p1114_p0 = scmp.ne.s32.totalorder %s586_s11, %s1113_s10  ;;  %s1265_s30 = smov [#allocation12]  }
 0x2f8   : > { %s1117_s29 = sshll.u32 %s1265_s30, 4  ;;  %s1118_s29 = int_to_ptr.vmem [resolvable:$false] %s1117_s29 }
 0x2f9   : > { %p1115_p8 = pnand %p1114_p0, %p1814_p2  ;;  %s1119_s7 = scalar_lea.vmem %s1118_s29, 256 }
 0x2fa   : > { %p1120_p7 = scmp.lt.s32.totalorder %s586_s11, %s1118_s29  ;;  %p1121_p13 = scmp.lt.s32.totalorder %s1119_s7, %s1113_s10 }
 0x2fb   : > { %s1816_s5 = smov %s1815_s27  ;;  %s1706_s1 = scalar_lea.hbm %s1815_s27, %s796_s24 }
 0x2fc   : > { %p1116_p10 = pneg %p1115_p8  ;;  %p1122_p6 = por %p1121_p13, %p1120_p7 }
 0x2fe   : > { %p1123_p11 = pnand %p1122_p6, %p1116_p10 }
 0x300   : > { %1126 = shalt.err (!%p1123_p11)
}
 0x301   : > { %s1127_s25 = scalar_lea.hbm %s1706_s1, 128  ;;  %s1131_s13 = scalar_lea.hbm %s1816_s5, 256 }
 0x302   : > { %p1128_p1 = scmp.ne.s32.totalorder %s1706_s1, %s1127_s25  ;;  %p1132_p4 = scmp.lt.u32.totalorder %s1706_s1, %s1816_s5 }
 0x303   : > { %p1133_p5 = scmp.lt.u32.totalorder %s1131_s13, %s1127_s25  ;;  %p1135_p0 = scmp.lt.u32.totalorder %s1127_s25, %s1706_s1 }
 0x304   : > { %p1129_p3 = pnand %p1128_p1, %p1814_p2 }
 0x305   : > { %p1134_p12 = por %p1133_p5, %p1132_p4 }
 0x306   : > { %p1130_p9 = pneg %p1129_p3 }
 0x307   : > { %p1136_p8 = por %p1135_p0, %p1134_p12 }
 0x309   : > { %p1137_p10 = pnand %p1136_p8, %p1130_p9 }
 0x30b   : > { %1140 = shalt.err (!%p1137_p10)
}
 0x30c   : > { %833 = dma.vmem_to_hbm [thread:$0]  (%p1814_p2), %s586_s11, 128, %s1706_s1, %s559_s4  }
 0x30d PF: > { %s1817_s8 = sld [smem:[#allocation22_spill]]  ;;  %s1818_s28 = sld [smem:[#allocation20_spill]] }
 0x30e   : > { %s1819_s12 = sld [smem:[#allocation27_spill]] }
 0x313   : > { %p857_p7 = scmp.ge.s32.totalorder %s1817_s8, 2  ;;  %s597_s17 = sand.u32 1, %s1818_s28  }
 0x314   : > { %p1820_p13 = scmp.ne.s32.totalorder %s1819_s12, 0  ;;  %s598_s15 = scalar_lea.sflag [#allocation5], %s597_s17 }
 0x316   : > { %p850_p6 = pnand %p857_p7, %p1820_p13 }
 0x318   : > { %1202 = dma.done.wait (!%p850_p6), %s598_s15, 128  }
 0x319   : > { %1204 = vsyncadd (!%p850_p6), %s598_s15, 4294967168  ;;  %s607_s14 = scalar_lea.sflag [#allocation13], %s597_s17 }
 0x31a   : > { %1206 = dma.done.wait (!%p850_p6), %s607_s14, 128  }
 0x31b   : > { %1208 = vsyncadd (!%p850_p6), %s607_s14, 4294967168  ;;  %s31_s28 = sadd.s32 1, %s1817_s8   ;;  %s1821_s27 = sld [smem:[#allocation25_spill]] }
 0x31c   : > { %p28_p11 = scmp.ge.s32.totalorder %s31_s28, 62   ;;  %s1822_s1 = sld [smem:[#allocation26_spill]] }
 0x31d   : > { %s1823_s25 = sld [smem:[#allocation21_spill]]  ;;  %s1824_s11 = sld [smem:[#allocation23_spill]] }
 0x31e   : > { %s1825_s4 = sld [smem:[#allocation24_spill]]  ;;  %s1826_s18 = smov %s1215_s19 }
 0x31f   : > { %s1827_s19 = smov %s1219_s20  ;;  %s1829_s21 = smov %s1227_s22 }
 0x320   : > { %s1830_s22 = smov %s1231_s23  ;;  %s1832_s24 = smov %s1243_s26 }
 0x321   : > { %s1828_s20 = smov %s1821_s27  ;;  %30 = sbr.rel (!%p28_p11) target bundleno = 19 (0x13), region = 143 }
 0x322   : > { %s1831_s23 = smov %s1822_s1 }
 0x323   : > { %s1833_s26 = smov %s1824_s11 }
 0x324   : > { %s1834_s27 = smov %s1825_s4 }
 0x328   :  { %612 = vsyncpa [#allocation4], 1 }
 0x329   :  { %614 = vsyncpa [#allocation4 + $0x1], 1 }
 0x32a   :  { %615 = vsyncpa [#allocation7], 1 }
 0x32b   :  { %617 = vsyncpa [#allocation7 + $0x1], 1 }
 0x32c   :  { %618 = vsyncpa [#allocation10], 1 }
 0x32d   :  { %620 = vsyncpa [#allocation10 + $0x1], 1 }
 0x32e   :  { %621 = vsyncpa [#allocation5], 1 }
 0x32f   :  { %623 = vsyncpa [#allocation5 + $0x1], 1 }
 0x330   :  { %624 = vsyncpa [#allocation13], 1 }
 0x331   :  { %626 = vsyncpa [#allocation13 + $0x1], 1 }

</bundles_post_ra>
